<compile_context>
chip_gen: v7x
topology: tpu7x:2x2x1
jax: 0.10.0
libtpu: 0.0.40
codegen_flags: <defaults>
</compile_context>

<pallas_src>
import jax
import jax.numpy as jnp
from jax import lax
from jax.experimental import pallas as pl
from jax.experimental.pallas import tpu as pltpu

NFRAMES = 8      # T
BS = 2           # batch
D_MODEL = 32     # d_model


def _time_encoding_kernel(x_ref, scale_ref, o_ref):
    # x_ref:     (T, bs*D) float32  activations, lane-dense
    # scale_ref: (T, bs*D) float32  mask[t,b] / (lengths[b]-1), lane-broadcast
    #
    # out[t, :] = x[t, :] + t * scale[t, :]
    t_idx = lax.broadcasted_iota(jnp.int32, x_ref.shape, 0).astype(jnp.float32)
    o_ref[...] = x_ref[...] + scale_ref[...] * t_idx
    # TODO(synk): nn.Dropout(p=0.1) treated as identity (eval/inference mode).


def time_encoding(x, mask, lengths):
    """x: (T, bs, D) f32, mask: (bs, T) bool/int, lengths: (bs,) int -> (T, bs, D) f32."""
    t, bs, d = x.shape

    # Wrapper-side pre-fold (tiny ops that fuse with the existing transpose/cast):
    #   scale[t, b] = mask[b, t] / (lengths[b] - 1)
    scale = jnp.transpose(mask.astype(jnp.float32)) / (
        lengths.astype(jnp.float32)[None, :] - 1.0)                     # (T, bs)
    scale_ld = jnp.broadcast_to(scale[:, :, None], (t, bs, d)).reshape(t, bs * d)
    x_ld = x.reshape(t, bs * d)                                          # (T, bs*D)

    out = pl.pallas_call(
        _time_encoding_kernel,
        grid=(1,),
        in_specs=[
            pl.BlockSpec((t, bs * d), lambda i: (0, 0)),
            pl.BlockSpec((t, bs * d), lambda i: (0, 0)),
        ],
        out_specs=pl.BlockSpec((t, bs * d), lambda i: (0, 0)),
        out_shape=jax.ShapeDtypeStruct((t, bs * d), jnp.float32),
        input_output_aliases={0: 0},       # in-place add on x's buffer
        compiler_params=pltpu.CompilerParams(
            dimension_semantics=("arbitrary",)),
    )(x_ld, scale_ld)
    return out.reshape(t, bs, d)


def _reference(x, mask, lengths):
    # Pure-JAX mirror of the PyTorch forward (dropout = identity), for validation.
    time = mask.astype(jnp.float32) / (lengths.astype(jnp.float32)[:, None] - 1.0)
    time = time * jnp.arange(time.shape[1], dtype=jnp.float32)[None, :]   # (bs, T)
    time = time.T                                                         # (T, bs)
    return x + time[..., None]


if __name__ == "__main__":
    key = jax.random.PRNGKey(0)
    x = jax.random.normal(key, (NFRAMES, BS, D_MODEL), jnp.float32)
    lengths = jnp.array([NFRAMES, NFRAMES - 2], jnp.int32)            # [8, 6]
    mask = jnp.arange(NFRAMES)[None, :] < lengths[:, None]            # (bs, T) bool

    fwd = jax.jit(time_encoding)
    out = jax.block_until_ready(fwd(x, mask, lengths))

    ref = _reference(x, mask, lengths)
    assert out.shape == (NFRAMES, BS, D_MODEL)
    assert bool(jnp.all(jnp.isfinite(out)))
    assert bool(jnp.allclose(out, ref, atol=1e-5, rtol=1e-5))
    print("KERNEL_OK")
</pallas_src>

<mosaic_0001>
module attributes {stable_mosaic.version = 11 : i64} {
  func.func @_time_encoding_kernel(%arg0: i32, %arg1: memref<8x64xf32, #tpu.memory_space<vmem>>, %arg2: memref<8x64xf32, #tpu.memory_space<vmem>>, %arg3: memref<8x64xf32, #tpu.memory_space<vmem>>) attributes {dimension_semantics = [#tpu.dimension_semantics<arbitrary>], iteration_bounds = array<i64: 1>, scalar_prefetch = 0 : i64, scratch_operands = 0 : i64, tpu.core_type = #tpu.core_type<tc>, window_params = [{pipeline_mode = #tpu.pipeline_mode<synchronous>, transform_indices = @transform_0, window_bounds = array<i64: 8, 64>}, {pipeline_mode = #tpu.pipeline_mode<synchronous>, transform_indices = @transform_1, window_bounds = array<i64: 8, 64>}, {pipeline_mode = #tpu.pipeline_mode<synchronous>, transform_indices = @transform_2, window_bounds = array<i64: 8, 64>}]} {
    %0 = tpu.iota {dimensions = array<i32: 0>} : vector<8x64xi32>
    %1 = arith.sitofp %0 : vector<8x64xi32> to vector<8x64xf32>
    %c0 = arith.constant 0 : index
    %c0_0 = arith.constant 0 : index
    %2 = vector.load %arg1[%c0, %c0_0] : memref<8x64xf32, #tpu.memory_space<vmem>>, vector<8x64xf32>
    %c0_1 = arith.constant 0 : index
    %c0_2 = arith.constant 0 : index
    %3 = vector.load %arg2[%c0_1, %c0_2] : memref<8x64xf32, #tpu.memory_space<vmem>>, vector<8x64xf32>
    %4 = arith.mulf %3, %1 : vector<8x64xf32>
    %5 = arith.addf %2, %4 : vector<8x64xf32>
    %c0_3 = arith.constant 0 : index
    %c0_4 = arith.constant 0 : index
    %6 = vector.load %arg3[%c0_3, %c0_4] : memref<8x64xf32, #tpu.memory_space<vmem>>, vector<8x64xf32>
    tpu.vector_store %arg3[%c0_3, %c0_4], %5 {strides = array<i32>} : memref<8x64xf32, #tpu.memory_space<vmem>>, vector<8x64xf32>,
    return
  }
  func.func @transform_0(%arg0: i32) -> (i32, i32) {
    %c0_i32 = arith.constant 0 : i32
    %c0_i32_0 = arith.constant 0 : i32
    %c0_i32_1 = arith.constant 0 : i32
    return %c0_i32, %c0_i32_0 : i32, i32
  }
  func.func @transform_1(%arg0: i32) -> (i32, i32) {
    %c0_i32 = arith.constant 0 : i32
    %c0_i32_0 = arith.constant 0 : i32
    %c0_i32_1 = arith.constant 0 : i32
    return %c0_i32, %c0_i32_0 : i32, i32
  }
  func.func @transform_2(%arg0: i32) -> (i32, i32) {
    %c0_i32 = arith.constant 0 : i32
    %c0_i32_0 = arith.constant 0 : i32
    %c0_i32_1 = arith.constant 0 : i32
    return %c0_i32, %c0_i32_0 : i32, i32
  }
}

</mosaic_0001>

<bundles_post_ra>
// kernel: time_encoding.1
= control target key start
LH: loop header
LB: loop body
LE: loop exit
PB: predicated region body
PF: predicated region fallthrough
CT: control target
= control target key end

     0   :  { %v11_v0 = vlaneseq  ;;  %vm18_vm0 = vcmask 523264   ;;  %s48_s1 = inlined_call_operand.vmem [shape: f32[8,64], index: 1, kind: input, shape index: {}]   ;;  %s49_s0 = inlined_call_operand.vmem [shape: f32[8,64], index: 0, kind: input, shape index: {}, may-alias: {0,2}]   ;;  %s50_s2 = inlined_call_operand.vmem [shape: f32[8,64], index: 2, kind: output, shape index: {}, may-alias: {0,2}]  }
   0x1   :  { %v15_v2 = vld [vmem:[%s48_s1] sm:$0xff] }
   0x2   :  { %v12_v1 = vshrl.u32 %v11_v0, 7  ;;  %v14_v4 = vld [vmem:[%s49_s0] sm:$0xff] }
   0x4   :  { %v13_v3 = vcvt.s32.f32 %v12_v1 }
   0x6   :  { %v16_v5 = vmul.f32 %v15_v2, %v13_v3 }
   0x8   :  { %v17_v6 = vadd.f32 %v16_v5, %v14_v4 }
   0xa   :  { %19 = vst.msk [vmem:[%s50_s2] sm:$0xff] %vm18_vm0, %v17_v6 }

</bundles_post_ra>
